<compile_context>
chip_gen: v6e
topology: v6e:2x2x1
jax: 0.10.0
libtpu: 0.0.40
codegen_flags: <defaults>
</compile_context>

<pallas_src>
import math

import jax
import jax.numpy as jnp
from jax.experimental import pallas as pl
from jax.experimental.pallas import tpu as pltpu


def _round_up(n, m):
    return ((n + m - 1) // m) * m


def erase_add_kernel(x_ref, w_ref, wfT_ref, bf_ref, o_ref):
    # x_ref:   (TM, D)   rows of the flattened [B*C, D] input (streamed)
    # w_ref:   (TM, 1)   per-row (per-concept) gate weight (streamed)
    # wfT_ref: (D, 2D)   concat(We^T, Wa^T)  (VMEM-resident across grid steps)
    # bf_ref:  (1, 2D)   concat(be, ba)      (VMEM-resident across grid steps)
    x = x_ref[...]
    w = w_ref[...]
    D = x.shape[-1]

    # One fused MXU pass for both linear layers; accumulate in f32.
    xc = x.astype(wfT_ref.dtype)
    gates = jnp.dot(xc, wfT_ref[...], preferred_element_type=jnp.float32)
    gates = gates + bf_ref[...]

    erase_gate = jax.nn.sigmoid(gates[:, :D])   # sigmoid(x @ We^T + be)
    add_feat = jnp.tanh(gates[:, D:])           # tanh(x @ Wa^T + ba)

    # res = x - w*erase*x + w*add  ==  x*(1 - w*erase) + w*add
    xf = x.astype(jnp.float32)
    res = xf * (1.0 - w * erase_gate) + w * add_feat
    o_ref[...] = res.astype(o_ref.dtype)


def erase_add_gate(x, weight, We, be, Wa, ba, *, tm=512, mxu_dtype=jnp.float32):
    """x: [B, C, D]; weight: [C]; We/Wa: [D, D] (PyTorch Linear weight);
    be/ba: [D].  mxu_dtype: dtype of the matmul operands (f32 or bf16)."""
    B, C, D = x.shape
    rows = B * C

    x2 = x.reshape(rows, D)
    # per-row gate weight: row (b*C + c) uses weight[c]
    w_rows = jnp.broadcast_to(
        weight.astype(jnp.float32)[None, :], (B, C)
    ).reshape(rows, 1)
    # fused, pre-transposed weights / biases so the kernel does a single x @ W
    wfT = jnp.concatenate([We.T, Wa.T], axis=1).astype(mxu_dtype)   # (D, 2D)
    bf = jnp.concatenate([be, ba]).reshape(1, 2 * D).astype(jnp.float32)

    # Row tile: as large as reasonable, multiple of 8 sublanes.
    TM = _round_up(min(tm, _round_up(rows, 8)), 8)
    grid = (pl.cdiv(rows, TM),)

    # Explicit VMEM budget: double-buffered x / out / w-row tiles + resident
    # fused weights.  Plenty of headroom but well under the v7x 64 MiB budget.
    item = jnp.dtype(x.dtype).itemsize
    est = (2 * TM * D * (item + item)                       # x + out, double-buffered
           + 2 * TM * 1 * 4                                 # per-row weight, double-buffered
           + D * 2 * D * jnp.dtype(mxu_dtype).itemsize      # fused weights (resident)
           + 2 * D * 4)                                     # fused bias (resident)
    vmem_limit = int(min(100 * 2**20, max(32 * 2**20, 4 * est)))

    out2 = pl.pallas_call(
        erase_add_kernel,
        out_shape=jax.ShapeDtypeStruct((rows, D), x.dtype),
        grid_spec=pltpu.PrefetchScalarGridSpec(
            num_scalar_prefetch=0,
            grid=grid,
            in_specs=[
                pl.BlockSpec((TM, D), lambda r: (r, 0)),        # x rows (streamed)
                pl.BlockSpec((TM, 1), lambda r: (r, 0)),        # per-row weight
                pl.BlockSpec((D, 2 * D), lambda r: (0, 0)),     # We^T | Wa^T (resident)
                pl.BlockSpec((1, 2 * D), lambda r: (0, 0)),     # be | ba (resident)
            ],
            out_specs=pl.BlockSpec((TM, D), lambda r: (r, 0)),
        ),
        compiler_params=pltpu.CompilerParams(
            dimension_semantics=("parallel",),
            vmem_limit_bytes=vmem_limit,
        ),
    )(x2, w_rows, wfT, bf)

    return out2.reshape(B, C, D)


def reference(x, weight, We, be, Wa, ba):
    erase_gate = jax.nn.sigmoid(jnp.einsum("bcd,ed->bce", x, We) + be)
    add_feat = jnp.tanh(jnp.einsum("bcd,ed->bce", x, Wa) + ba)
    w = weight.reshape(1, -1, 1)
    return x - w * erase_gate * x + w * add_feat


if __name__ == "__main__":
    B, C, D = 2, 8, 32  # batch, num_c, feature_dim

    key = jax.random.PRNGKey(0)
    kx, kw, kwe, kbe, kwa, kba = jax.random.split(key, 6)

    x = jax.random.normal(kx, (B, C, D), dtype=jnp.float32)

    # Deterministic init mimicking the PyTorch module:
    #   self.weight ~ U(-1/sqrt(num_c), 1/sqrt(num_c))
    #   nn.Linear default: U(-1/sqrt(feature_dim), 1/sqrt(feature_dim))
    stdv_c = 1.0 / math.sqrt(C)
    stdv_d = 1.0 / math.sqrt(D)
    weight = jax.random.uniform(kw, (C,), minval=-stdv_c, maxval=stdv_c)
    We = jax.random.uniform(kwe, (D, D), minval=-stdv_d, maxval=stdv_d)
    be = jax.random.uniform(kbe, (D,), minval=-stdv_d, maxval=stdv_d)
    Wa = jax.random.uniform(kwa, (D, D), minval=-stdv_d, maxval=stdv_d)
    ba = jax.random.uniform(kba, (D,), minval=-stdv_d, maxval=stdv_d)

    ref = reference(x, weight, We, be, Wa, ba)

    # f32 MXU-operand path (exact vs. reference).
    out = erase_add_gate(x, weight, We, be, Wa, ba)
    out = jax.block_until_ready(out)
    assert out.shape == (B, C, D)
    assert jnp.allclose(out, ref, atol=1e-5, rtol=1e-5), "f32 path mismatch vs reference"

    # bf16 MXU-operand path (v6e/v7x optimization): looser tolerance — the
    # matmul inputs are bf16-rounded but accumulation / gating stays f32.
    out_bf16 = erase_add_gate(x, weight, We, be, Wa, ba, mxu_dtype=jnp.bfloat16)
    out_bf16 = jax.block_until_ready(out_bf16)
    assert jnp.allclose(out_bf16, ref, atol=1e-1, rtol=1e-1), "bf16 path mismatch vs reference"

    print("KERNEL_OK")
</pallas_src>

<mosaic_0001>
module attributes {stable_mosaic.version = 11 : i64} {
  func.func @erase_add_kernel(%arg0: i32, %arg1: memref<16x32xf32, #tpu.memory_space<vmem>>, %arg2: memref<16x1xf32, #tpu.memory_space<vmem>>, %arg3: memref<32x64xf32, #tpu.memory_space<vmem>>, %arg4: memref<1x64xf32, #tpu.memory_space<vmem>>, %arg5: memref<16x32xf32, #tpu.memory_space<vmem>>) attributes {dimension_semantics = [#tpu.dimension_semantics<parallel>], iteration_bounds = array<i64: 1>, scalar_prefetch = 0 : i64, scratch_operands = 0 : i64, tpu.core_type = #tpu.core_type<tc>, window_params = [{transform_indices = @transform_0, window_bounds = array<i64: 16, 32>}, {transform_indices = @transform_1, window_bounds = array<i64: 16, 1>}, {pipeline_mode = #tpu.pipeline_mode<synchronous>, transform_indices = @transform_2, window_bounds = array<i64: 32, 64>}, {pipeline_mode = #tpu.pipeline_mode<synchronous>, transform_indices = @transform_3, window_bounds = array<i64: 1, 64>}, {transform_indices = @transform_4, window_bounds = array<i64: 16, 32>}]} {
    %c0 = arith.constant 0 : index
    %c0_0 = arith.constant 0 : index
    %0 = vector.load %arg1[%c0, %c0_0] : memref<16x32xf32, #tpu.memory_space<vmem>>, vector<16x32xf32>
    %c0_1 = arith.constant 0 : index
    %c0_2 = arith.constant 0 : index
    %1 = vector.load %arg2[%c0_1, %c0_2] : memref<16x1xf32, #tpu.memory_space<vmem>>, vector<16x1xf32>
    %c0_3 = arith.constant 0 : index
    %c0_4 = arith.constant 0 : index
    %2 = vector.load %arg3[%c0_3, %c0_4] : memref<32x64xf32, #tpu.memory_space<vmem>>, vector<32x64xf32>
    %cst = arith.constant dense<0.000000e+00> : vector<16x64xf32>
    %3 = tpu.matmul %0, %2, %cst {dimension_numbers = #tpu.dot_dimension_numbers<[1], [0], [0], [1], [0, 0, 1, 1], [], []>} : vector<16x32xf32>, vector<32x64xf32>, vector<16x64xf32> -> vector<16x64xf32>
    %c0_5 = arith.constant 0 : index
    %c0_6 = arith.constant 0 : index
    %4 = vector.load %arg4[%c0_5, %c0_6] : memref<1x64xf32, #tpu.memory_space<vmem>>, vector<1x64xf32>
    %5 = vector.broadcast %4 : vector<1x64xf32> to vector<16x64xf32>
    %6 = arith.addf %3, %5 : vector<16x64xf32>
    %7 = vector.extract_strided_slice %6 {offsets = [0, 0], sizes = [16, 32], strides = [1, 1]} : vector<16x64xf32> to vector<16x32xf32>
    %8 = arith.negf %7 : vector<16x32xf32>
    %9 = math.exp %8 : vector<16x32xf32>
    %cst_7 = arith.constant 1.000000e+00 : f32
    %10 = vector.broadcast %cst_7 : f32 to vector<16x32xf32>
    %11 = arith.addf %10, %9 : vector<16x32xf32>
    %12 = arith.divf %10, %11 : vector<16x32xf32>
    %13 = vector.extract_strided_slice %6 {offsets = [0, 32], sizes = [16, 32], strides = [1, 1]} : vector<16x64xf32> to vector<16x32xf32>
    %14 = math.tanh %13 : vector<16x32xf32>
    %15 = vector.broadcast %1 : vector<16x1xf32> to vector<16x32xf32>
    %16 = arith.mulf %15, %12 : vector<16x32xf32>
    %cst_8 = arith.constant 1.000000e+00 : f32
    %17 = vector.broadcast %cst_8 : f32 to vector<16x32xf32>
    %18 = arith.subf %17, %16 : vector<16x32xf32>
    %19 = arith.mulf %0, %18 : vector<16x32xf32>
    %20 = vector.broadcast %1 : vector<16x1xf32> to vector<16x32xf32>
    %21 = arith.mulf %20, %14 : vector<16x32xf32>
    %22 = arith.addf %19, %21 : vector<16x32xf32>
    %c0_9 = arith.constant 0 : index
    %c0_10 = arith.constant 0 : index
    %23 = vector.load %arg5[%c0_9, %c0_10] : memref<16x32xf32, #tpu.memory_space<vmem>>, vector<16x32xf32>
    tpu.vector_store %arg5[%c0_9, %c0_10], %22 {strides = array<i32>} : memref<16x32xf32, #tpu.memory_space<vmem>>, vector<16x32xf32>,
    return
  }
  func.func @transform_0(%arg0: i32) -> (i32, i32) {
    %c0_i32 = arith.constant 0 : i32
    %c0_i32_0 = arith.constant 0 : i32
    return %arg0, %c0_i32 : i32, i32
  }
  func.func @transform_1(%arg0: i32) -> (i32, i32) {
    %c0_i32 = arith.constant 0 : i32
    %c0_i32_0 = arith.constant 0 : i32
    return %arg0, %c0_i32 : i32, i32
  }
  func.func @transform_2(%arg0: i32) -> (i32, i32) {
    %c0_i32 = arith.constant 0 : i32
    %c0_i32_0 = arith.constant 0 : i32
    %c0_i32_1 = arith.constant 0 : i32
    return %c0_i32, %c0_i32_0 : i32, i32
  }
  func.func @transform_3(%arg0: i32) -> (i32, i32) {
    %c0_i32 = arith.constant 0 : i32
    %c0_i32_0 = arith.constant 0 : i32
    %c0_i32_1 = arith.constant 0 : i32
    return %c0_i32, %c0_i32_0 : i32, i32
  }
  func.func @transform_4(%arg0: i32) -> (i32, i32) {
    %c0_i32 = arith.constant 0 : i32
    %c0_i32_0 = arith.constant 0 : i32
    return %arg0, %c0_i32 : i32, i32
  }
}

</mosaic_0001>

<bundles_post_ra>
// kernel: tpu_custom_call.1
= control target key start
LH: loop header
LB: loop body
LE: loop exit
PB: predicated region body
PF: predicated region fallthrough
CT: control target
= control target key end

     0   :  { %9 = vsyncpa [#allocation3], 0  ;;  %s337_s0 = inlined_call_operand.vmem [shape: f32[16,32], index: 0, kind: input, shape index: {}]   ;;  %s338_s1 = inlined_call_operand.vmem [shape: f32[16,1], index: 1, kind: input, shape index: {}]   ;;  %s339_s2 = inlined_call_operand.hbm [shape: f32[32,64], index: 2, kind: input, shape index: {}]   ;;  %s340_s3 = inlined_call_operand.vmem [shape: f32[1,64], index: 3, kind: input, shape index: {}]   ;;  %s341_s4 = inlined_call_operand.hbm [shape: f32[16,32], index: 4, kind: output, shape index: {}]  }
   0x1   :  { %10 = vsyncpa [#allocation4], 0  ;;  %s275_s15 = smov [#allocation2]  }
   0x2   :  { %s20_s16 = sshll.u32 %s275_s15, 4  ;;  %s21_s16 = int_to_ptr.vmem [resolvable:$true] %s20_s16 }
   0x3   :  { %s239_s17 = scalar_lea.vmem %s21_s16, 512  ;;  %p244_p1 = scmp.lt.s32.totalorder %s21_s16, %s21_s16 }
   0x4   :  { %p240_p0 = scmp.ne.s32.totalorder %s21_s16, %s239_s17  ;;  %p245_p2 = scmp.lt.s32.totalorder %s239_s17, %s239_s17 }
   0x6   :  { %p246_p3 = por %p245_p2, %p244_p1 }
   0x8   :  { %p247_p4 = pnand %p246_p3, %p240_p0 }
   0xa   :  { %250 = shalt.err (!%p247_p4)
}
   0xb   :  { %s276_s18 = smov 128   ;;  %s277_s19 = smov 8  }
   0xc   :  { %26 = dma.hbm_to_vmem [thread:$0]  %s339_s2, 512, %s21_s16, [#allocation3], %s276_s18, %s276_s18, %s277_s19  }
   0xd   :  { %271 = dma.done.wait [#allocation3], 512  }
   0xe   :  { %272 = vsyncadd [#allocation3], 4294966784  ;;  %v278_v0 = vmov 0   ;;  %vm47_vm0 = vcmask 261120   ;;  %v39_v1 = vld [vmem:[#allocation2 + $0x18] sm:$0xff]  ;;  %v38_v2 = vld [vmem:[#allocation2 + $0x10] sm:$0xff] }
   0xf   :  { %218 = vset.pattern.permute.xlu0 %v278_v0  ;;  %201 = vmatprep.subr.mxu0 %v39_v1  ;;  %v32_v3 = vld [vmem:[%s337_s0] sm:$0xff]  ;;  %v37_v4 = vld [vmem:[#allocation2 + $0x8] sm:$0xff] }
  0x10   :  { %202 = vmatpush3.msra.mxu0 %v39_v1  ;;  %209 = vmatprep.mubr.msk.f32.mxu0 %vm47_vm0, %v32_v3  ;;  %v34_v5 = vld [vmem:[%s338_s1] sm:$0xff]  ;;  %v35_v7 = vld [vmem:[%s338_s1 + $0x8] sm:$0xff]  ;;  %s280_s1 = smov [#allocation5]  }
  0x11   :  { %203 = vmatprep.subr.mxu0 %v38_v2  ;;  %145 = vperm.xlu0 %218, %v34_v5   ;;  %v36_v6 = vld [vmem:[#allocation2] sm:$0xff]  ;;  %v33_v8 = vld [vmem:[%s337_s0 + $0x8] sm:$0xff]  ;;  %s279_s0 = smov 96  }
  0x12   :  { %204 = vmatpush3.msra.mxu0 %v38_v2  ;;  %v190_v9 = vld [vmem:[%s340_s3] ss:$0 sm:$0xff]  ;;  %s178_s3 = sshll.u32 %s280_s1, 4  ;;  %s179_s3 = int_to_ptr.vmem [resolvable:$true] %s178_s3 }
  0x13   :  { %205 = vmatprep.subr.mxu0 %v37_v4  ;;  %s251_s5 = scalar_lea.vmem %s179_s3, 256  ;;  %p256_p6 = scmp.lt.s32.totalorder %s179_s3, %s179_s3 }
  0x14   :  { %206 = vmatpush3.msra.mxu0 %v37_v4  ;;  %p252_p5 = scmp.ne.s32.totalorder %s179_s3, %s251_s5  ;;  %p257_p7 = scmp.lt.s32.totalorder %s251_s5, %s251_s5 }
  0x15   :  { %207 = vmatprep.subr.mxu0 %v36_v6  ;;  %150 = vperm.xlu0 %218, %v35_v7  }
  0x16   :  { %208 = vmatpush3.msra.mxu0 %v36_v6  ;;  %p258_p8 = por %p257_p7, %p256_p6 }
  0x17   :  { %210 = vmatmul.mubr.msk.f32.vlgmr.msra.gmra.mxu0 %vm47_vm0, %v33_v8 }
  0x18   :  { %p259_p9 = pnand %p258_p8, %p252_p5 }
  0x8c   :  { %v146_v15 = vpop.permute.xlu0 %145 }
  0x90   :  { %v151_v21 = vpop.permute.xlu0 %150 }
  0xd7   :  { %v211_v10 = vpop.f32.mrf.mxu0 }
  0xd8   :  { %v126_v11 = vadd.f32 %v211_v10, %v190_v9 }
  0xd9   :  { %v120_v12 = vpop.f32.mrf.mxu0 }
  0xda   :  { %v194_v13 = vmul.f32 -1.442695, %v126_v11  ;;  %v121_v14 = vadd.f32 %v190_v9, %v120_v12 }
  0xdc   :  { %219 = vpow2.f32 %v194_v13  ;;  %v193_v25 = vmul.f32 -1.442695, %v121_v14 }
  0xdd   :  { %221 = vtanh.f32 %v121_v14 }
  0xde   :  { %223 = vtanh.f32 %v126_v11 }
  0xe9   :  { %v220_v16 = vpop.eup %219 }
  0xea   :  { %v222_v17 = vpop.eup %221  ;;  %v136_v18 = vadd.f32 1.0, %v220_v16 }
  0xeb   :  { %v159_v19 = vmul.f32 %v222_v17, %v146_v15  ;;  %v224_v20 = vpop.eup %223 }
  0xec   :  { %225 = vrcp.f32 %v136_v18  ;;  %v160_v22 = vmul.f32 %v224_v20, %v151_v21 }
  0xed   :  { %163 = vrot.lane.b32.xlu1 %v159_v19, %s279_s0  ;;  %227 = vpow2.f32 %v193_v25 }
  0xf1   :  { %165 = vrot.lane.b32.xlu1 %v160_v22, %s279_s0 }
  0xf9   :  { %v226_v23 = vpop.eup %225 }
  0xfa   :  { %v154_v24 = vmul.f32 %v226_v23, %v151_v21  ;;  %v228_v26 = vpop.eup %227 }
  0xfb   :  { %v135_v27 = vadd.f32 1.0, %v228_v26 }
  0xfc   :  { %v156_v31 = vsub.f32 1.0, %v154_v24 }
  0xfd   :  { %229 = vrcp.f32 %v135_v27 }
  0xfe   :  { %v158_v35 = vmul.f32 %v156_v31, %v33_v8 }
 0x10a   :  { %v230_v28 = vpop.eup %229 }
 0x10b   :  { %v153_v29 = vmul.f32 %v230_v28, %v146_v15 }
 0x10d   :  { %v155_v30 = vsub.f32 1.0, %v153_v29 }
 0x10f   :  { %v157_v32 = vmul.f32 %v155_v30, %v32_v3 }
 0x15f   :  { %v164_v33 = vpop.permute.xlu1 %163 }
 0x160   :  { %v169_v34 = vadd.f32 %v164_v33, %v157_v32 }
 0x162   :  { %171 = vst.msk [vmem:[#allocation5] sm:$0xff] %vm47_vm0, %v169_v34 }
 0x163   :  { %v166_v36 = vpop.permute.xlu1 %165 }
 0x164   :  { %v170_v37 = vadd.f32 %v166_v36, %v158_v35 }
 0x166   :  { %172 = vst.msk [vmem:[#allocation5 + $0x8] sm:$0xff] %vm47_vm0, %v170_v37 }
 0x167   :  { %262 = shalt.err (!%p259_p9)
}
 0x168   :  { %184 = dma.vmem_to_hbm [thread:$0]  %s179_s3, 256, %s341_s4, [#allocation4], %s276_s18, %s276_s18, %s277_s19  }
 0x169   :  { %273 = dma.done.wait [#allocation4], 256  }
 0x16a   :  { %274 = vsyncadd [#allocation4], 4294967040 }
 0x16b   :  { %188 = vsyncpa [#allocation3], 1 }
 0x16c   :  { %189 = vsyncpa [#allocation4], 1 }

</bundles_post_ra>
